<compile_context>
chip_gen: v7x
topology: tpu7x:2x2x1
jax: 0.10.0
libtpu: 0.0.40
codegen_flags: <defaults>
</compile_context>

<pallas_src>
import jax
import jax.numpy as jnp
from jax.experimental import pallas as pl
from jax.experimental.pallas import tpu as pltpu

_LANE = 128
_H1_PAD = 256   # 200 padded up to 2*128
_H2_PAD = 128   # 100 padded up to 128


def _round_up(n, m):
    return ((n + m - 1) // m) * m


def _mlp_kernel(x_ref, w1_ref, b1_ref, w2_ref, b2_ref, w3_ref, b3_ref, o_ref):
    # In-kernel f32 -> bf16 cast of x (VPU work hidden under DMA/MXU slack).
    x_bf = x_ref[...].astype(jnp.bfloat16)

    # Layer 1: Linear(in, 256pad) + bias + ReLU   (Dropout = identity, eval)
    h1 = jnp.dot(x_bf, w1_ref[...], preferred_element_type=jnp.float32)
    h1 = jnp.maximum(h1 + b1_ref[...], 0.0)

    # Layer 2: Linear(256pad, 128pad) + bias + ReLU   (Dropout = identity)
    h2 = jnp.dot(h1.astype(w2_ref.dtype), w2_ref[...],
                 preferred_element_type=jnp.float32)
    h2 = jnp.maximum(h2 + b2_ref[...], 0.0)

    # Layer 3: Linear(128pad, out_dim) + bias + ReLU.  N = real out_dim only;
    # no padded columns are ever computed or written to HBM.
    h3 = jnp.dot(h2.astype(w3_ref.dtype), w3_ref[...],
                 preferred_element_type=jnp.float32)
    h3 = jnp.maximum(h3 + b3_ref[...], 0.0)

    o_ref[...] = h3.astype(o_ref.dtype)


def concat_linear_forward(x, params, *, tile_b=2048):
    """x: (B, input_dim) f32. params: padded bf16 weights / f32 biases.
    Returns (B, out_dim) f32."""
    w1, b1 = params["w1"], params["b1"]
    w2, b2 = params["w2"], params["b2"]
    w3, b3 = params["w3"], params["b3"]

    B, in_dim = x.shape
    out_dim = w3.shape[1]

    # Batch tile: multiple of 8 sublanes, big enough to amortize per-step
    # overhead, but capped so the (megacore-parallel) grid has >= 2 steps
    # whenever there is enough work for both v7x TensorCores.
    tb = min(tile_b, _round_up(B, 8))
    if B > 16:
        tb = min(tb, _round_up(-(-B // 2), 8))
    grid = (pl.cdiv(B, tb),)   # ragged last tile: Pallas masks the writes

    flops = 2 * B * (in_dim * w1.shape[1]
                     + w1.shape[1] * w2.shape[1]
                     + w2.shape[1] * out_dim)
    bytes_accessed = (
        int(x.size) * x.dtype.itemsize
        + sum(int(p.size) * p.dtype.itemsize for p in (w1, b1, w2, b2, w3, b3))
        + B * out_dim * 4)

    out = pl.pallas_call(
        _mlp_kernel,
        out_shape=jax.ShapeDtypeStruct((B, out_dim), jnp.float32),
        grid=grid,
        in_specs=[
            pl.BlockSpec((tb, in_dim), lambda i: (i, 0)),   # x: tiled over batch
            pl.BlockSpec(w1.shape, lambda i: (0, 0)),       # weights/biases VMEM-resident
            pl.BlockSpec(b1.shape, lambda i: (0, 0)),
            pl.BlockSpec(w2.shape, lambda i: (0, 0)),
            pl.BlockSpec(b2.shape, lambda i: (0, 0)),
            pl.BlockSpec(w3.shape, lambda i: (0, 0)),
            pl.BlockSpec(b3.shape, lambda i: (0, 0)),
        ],
        out_specs=pl.BlockSpec((tb, out_dim), lambda i: (i, 0)),
        compiler_params=pltpu.CompilerParams(
            dimension_semantics=("parallel",),
            vmem_limit_bytes=32 * 1024 * 1024,
        ),
        cost_estimate=pl.CostEstimate(
            flops=flops, transcendentals=0, bytes_accessed=bytes_accessed),
    )(x, w1, b1, w2, b2, w3, b3)

    return out


def init_params(key, input_dim, output_dim):
    """nn.Linear-style uniform(+/-1/sqrt(fan_in)) init, stored transposed
    (in, out). Hidden dims zero-padded to 256/128; the final layer keeps its
    real out_dim columns (no output padding). Weights bf16, biases f32."""
    # (fan_in, fan_out, padded_in, padded_out)
    layer_dims = [
        (input_dim, 200, input_dim, _H1_PAD),
        (200, 100, _H1_PAD, _H2_PAD),
        (100, output_dim, _H2_PAD, output_dim),
    ]
    params = {}
    for i, (fan_in, fan_out, in_p, out_p) in enumerate(layer_dims, start=1):
        key, kw, kb = jax.random.split(key, 3)
        bound = 1.0 / float(fan_in) ** 0.5
        w = jax.random.uniform(kw, (fan_in, fan_out), jnp.float32,
                               minval=-bound, maxval=bound)
        b = jax.random.uniform(kb, (fan_out,), jnp.float32,
                               minval=-bound, maxval=bound)
        w_pad = jnp.zeros((in_p, out_p), jnp.float32).at[:fan_in, :fan_out].set(w)
        b_pad = jnp.zeros((1, out_p), jnp.float32).at[0, :fan_out].set(b)
        params[f"w{i}"] = w_pad.astype(jnp.bfloat16)   # MXU inputs in bf16
        params[f"b{i}"] = b_pad                        # bias add stays f32
    return params


def reference_forward(x, params):
    """Pure-JAX reference with identical numerics (bf16 matmul inputs,
    f32 accumulation, f32 epilogue)."""
    h = x.astype(jnp.bfloat16)
    h = jnp.maximum(jnp.dot(h, params["w1"],
                            preferred_element_type=jnp.float32) + params["b1"], 0.0)
    h = jnp.maximum(jnp.dot(h.astype(jnp.bfloat16), params["w2"],
                            preferred_element_type=jnp.float32) + params["b2"], 0.0)
    h = jnp.maximum(jnp.dot(h.astype(jnp.bfloat16), params["w3"],
                            preferred_element_type=jnp.float32) + params["b3"], 0.0)
    return h


if __name__ == "__main__":
    key = jax.random.PRNGKey(0)
    batch, input_dim, output_dim = 8, 32, 16

    key, kx = jax.random.split(key)
    x = jax.random.normal(kx, (batch, input_dim), jnp.float32)
    params = init_params(key, input_dim, output_dim)

    out = concat_linear_forward(x, params)
    out = jax.block_until_ready(out)

    ref = reference_forward(x, params)
    assert out.shape == (batch, output_dim)
    assert jnp.allclose(out, ref, atol=1e-4, rtol=1e-4), "mismatch vs JAX reference"

    print("KERNEL_OK")
</pallas_src>

<mosaic_0001>
module attributes {stable_mosaic.version = 11 : i64} {
  func.func @_mlp_kernel(%arg0: i32, %arg1: memref<8x32xf32, #tpu.memory_space<vmem>>, %arg2: memref<32x256xbf16, #tpu.memory_space<vmem>>, %arg3: memref<1x256xf32, #tpu.memory_space<vmem>>, %arg4: memref<256x128xbf16, #tpu.memory_space<vmem>>, %arg5: memref<1x128xf32, #tpu.memory_space<vmem>>, %arg6: memref<128x16xbf16, #tpu.memory_space<vmem>>, %arg7: memref<1x16xf32, #tpu.memory_space<vmem>>, %arg8: memref<8x16xf32, #tpu.memory_space<vmem>>) attributes {dimension_semantics = [#tpu.dimension_semantics<parallel>], iteration_bounds = array<i64: 1>, scalar_prefetch = 0 : i64, scratch_operands = 0 : i64, tpu.core_type = #tpu.core_type<tc>, window_params = [{transform_indices = @transform_0, window_bounds = array<i64: 8, 32>}, {pipeline_mode = #tpu.pipeline_mode<synchronous>, transform_indices = @transform_1, window_bounds = array<i64: 32, 256>}, {pipeline_mode = #tpu.pipeline_mode<synchronous>, transform_indices = @transform_2, window_bounds = array<i64: 1, 256>}, {pipeline_mode = #tpu.pipeline_mode<synchronous>, transform_indices = @transform_3, window_bounds = array<i64: 256, 128>}, {pipeline_mode = #tpu.pipeline_mode<synchronous>, transform_indices = @transform_4, window_bounds = array<i64: 1, 128>}, {pipeline_mode = #tpu.pipeline_mode<synchronous>, transform_indices = @transform_5, window_bounds = array<i64: 128, 16>}, {pipeline_mode = #tpu.pipeline_mode<synchronous>, transform_indices = @transform_6, window_bounds = array<i64: 1, 16>}, {transform_indices = @transform_7, window_bounds = array<i64: 8, 16>}]} {
    %c0 = arith.constant 0 : index
    %c0_0 = arith.constant 0 : index
    %0 = vector.load %arg1[%c0, %c0_0] : memref<8x32xf32, #tpu.memory_space<vmem>>, vector<8x32xf32>
    %1 = arith.truncf %0 : vector<8x32xf32> to vector<8x32xbf16>
    %c0_1 = arith.constant 0 : index
    %c0_2 = arith.constant 0 : index
    %2 = vector.load %arg2[%c0_1, %c0_2] : memref<32x256xbf16, #tpu.memory_space<vmem>>, vector<32x256xbf16>
    %cst = arith.constant dense<0.000000e+00> : vector<8x256xf32>
    %3 = tpu.matmul %1, %2, %cst {dimension_numbers = #tpu.dot_dimension_numbers<[1], [0], [0], [1], [0, 0, 1, 1], [], []>} : vector<8x32xbf16>, vector<32x256xbf16>, vector<8x256xf32> -> vector<8x256xf32>
    %c0_3 = arith.constant 0 : index
    %c0_4 = arith.constant 0 : index
    %4 = vector.load %arg3[%c0_3, %c0_4] : memref<1x256xf32, #tpu.memory_space<vmem>>, vector<1x256xf32>
    %5 = vector.broadcast %4 : vector<1x256xf32> to vector<8x256xf32>
    %6 = arith.addf %3, %5 : vector<8x256xf32>
    %cst_5 = arith.constant 0.000000e+00 : f32
    %7 = vector.broadcast %cst_5 : f32 to vector<8x256xf32>
    %8 = arith.maximumf %6, %7 : vector<8x256xf32>
    %9 = arith.truncf %8 : vector<8x256xf32> to vector<8x256xbf16>
    %c0_6 = arith.constant 0 : index
    %c0_7 = arith.constant 0 : index
    %10 = vector.load %arg4[%c0_6, %c0_7] : memref<256x128xbf16, #tpu.memory_space<vmem>>, vector<256x128xbf16>
    %cst_8 = arith.constant dense<0.000000e+00> : vector<8x128xf32>
    %11 = tpu.matmul %9, %10, %cst_8 {dimension_numbers = #tpu.dot_dimension_numbers<[1], [0], [0], [1], [0, 0, 1, 1], [], []>} : vector<8x256xbf16>, vector<256x128xbf16>, vector<8x128xf32> -> vector<8x128xf32>
    %c0_9 = arith.constant 0 : index
    %c0_10 = arith.constant 0 : index
    %12 = vector.load %arg5[%c0_9, %c0_10] : memref<1x128xf32, #tpu.memory_space<vmem>>, vector<1x128xf32>
    %13 = vector.broadcast %12 : vector<1x128xf32> to vector<8x128xf32>
    %14 = arith.addf %11, %13 : vector<8x128xf32>
    %cst_11 = arith.constant 0.000000e+00 : f32
    %15 = vector.broadcast %cst_11 : f32 to vector<8x128xf32>
    %16 = arith.maximumf %14, %15 : vector<8x128xf32>
    %17 = arith.truncf %16 : vector<8x128xf32> to vector<8x128xbf16>
    %c0_12 = arith.constant 0 : index
    %c0_13 = arith.constant 0 : index
    %18 = vector.load %arg6[%c0_12, %c0_13] : memref<128x16xbf16, #tpu.memory_space<vmem>>, vector<128x16xbf16>
    %cst_14 = arith.constant dense<0.000000e+00> : vector<8x16xf32>
    %19 = tpu.matmul %17, %18, %cst_14 {dimension_numbers = #tpu.dot_dimension_numbers<[1], [0], [0], [1], [0, 0, 1, 1], [], []>} : vector<8x128xbf16>, vector<128x16xbf16>, vector<8x16xf32> -> vector<8x16xf32>
    %c0_15 = arith.constant 0 : index
    %c0_16 = arith.constant 0 : index
    %20 = vector.load %arg7[%c0_15, %c0_16] : memref<1x16xf32, #tpu.memory_space<vmem>>, vector<1x16xf32>
    %21 = vector.broadcast %20 : vector<1x16xf32> to vector<8x16xf32>
    %22 = arith.addf %19, %21 : vector<8x16xf32>
    %cst_17 = arith.constant 0.000000e+00 : f32
    %23 = vector.broadcast %cst_17 : f32 to vector<8x16xf32>
    %24 = arith.maximumf %22, %23 : vector<8x16xf32>
    %c0_18 = arith.constant 0 : index
    %c0_19 = arith.constant 0 : index
    %25 = vector.load %arg8[%c0_18, %c0_19] : memref<8x16xf32, #tpu.memory_space<vmem>>, vector<8x16xf32>
    tpu.vector_store %arg8[%c0_18, %c0_19], %24 {strides = array<i32>} : memref<8x16xf32, #tpu.memory_space<vmem>>, vector<8x16xf32>,
    return
  }
  func.func @transform_0(%arg0: i32) -> (i32, i32) {
    %c0_i32 = arith.constant 0 : i32
    %c0_i32_0 = arith.constant 0 : i32
    return %arg0, %c0_i32 : i32, i32
  }
  func.func @transform_1(%arg0: i32) -> (i32, i32) {
    %c0_i32 = arith.constant 0 : i32
    %c0_i32_0 = arith.constant 0 : i32
    %c0_i32_1 = arith.constant 0 : i32
    return %c0_i32, %c0_i32_0 : i32, i32
  }
  func.func @transform_2(%arg0: i32) -> (i32, i32) {
    %c0_i32 = arith.constant 0 : i32
    %c0_i32_0 = arith.constant 0 : i32
    %c0_i32_1 = arith.constant 0 : i32
    return %c0_i32, %c0_i32_0 : i32, i32
  }
  func.func @transform_3(%arg0: i32) -> (i32, i32) {
    %c0_i32 = arith.constant 0 : i32
    %c0_i32_0 = arith.constant 0 : i32
    %c0_i32_1 = arith.constant 0 : i32
    return %c0_i32, %c0_i32_0 : i32, i32
  }
  func.func @transform_4(%arg0: i32) -> (i32, i32) {
    %c0_i32 = arith.constant 0 : i32
    %c0_i32_0 = arith.constant 0 : i32
    %c0_i32_1 = arith.constant 0 : i32
    return %c0_i32, %c0_i32_0 : i32, i32
  }
  func.func @transform_5(%arg0: i32) -> (i32, i32) {
    %c0_i32 = arith.constant 0 : i32
    %c0_i32_0 = arith.constant 0 : i32
    %c0_i32_1 = arith.constant 0 : i32
    return %c0_i32, %c0_i32_0 : i32, i32
  }
  func.func @transform_6(%arg0: i32) -> (i32, i32) {
    %c0_i32 = arith.constant 0 : i32
    %c0_i32_0 = arith.constant 0 : i32
    %c0_i32_1 = arith.constant 0 : i32
    return %c0_i32, %c0_i32_0 : i32, i32
  }
  func.func @transform_7(%arg0: i32) -> (i32, i32) {
    %c0_i32 = arith.constant 0 : i32
    %c0_i32_0 = arith.constant 0 : i32
    return %arg0, %c0_i32 : i32, i32
  }
}

</mosaic_0001>

<bundles_post_ra>
// kernel: tpu_custom_call.1
= control target key start
LH: loop header
LB: loop body
LE: loop exit
PB: predicated region body
PF: predicated region fallthrough
CT: control target
= control target key end

     0   :  { %12 = vsyncpa [#allocation3], 0  ;;  %s721_s0 = inlined_call_operand.vmem [shape: f32[8,32], index: 0, kind: input, shape index: {}]   ;;  %s722_s1 = inlined_call_operand.vmem [shape: bf16[32,256], index: 1, kind: input, shape index: {}]   ;;  %s723_s2 = inlined_call_operand.vmem [shape: f32[1,256], index: 2, kind: input, shape index: {}]   ;;  %s724_s3 = inlined_call_operand.hbm [shape: bf16[256,128], index: 3, kind: input, shape index: {}]   ;;  %s725_s4 = inlined_call_operand.vmem [shape: f32[1,128], index: 4, kind: input, shape index: {}]   ;;  %s726_s5 = inlined_call_operand.vmem [shape: bf16[128,16], index: 5, kind: input, shape index: {}]   ;;  %s727_s6 = inlined_call_operand.vmem [shape: f32[1,16], index: 6, kind: input, shape index: {}]   ;;  %s728_s7 = inlined_call_operand.hbm [shape: f32[8,16], index: 7, kind: output, shape index: {}]  }
   0x1   :  { %13 = vsyncpa [#allocation4], 0  ;;  %s602_s24 = smov [#allocation2]   ;;  %s554_s28 = scalar_lea.hbm %s724_s3, 2048 }
   0x2   :  { %s25_s25 = sshll.u32 %s602_s24, 4  ;;  %p555_p0 = scmp.ne.s32.totalorder %s724_s3, %s554_s28  ;;  %s26_s25 = int_to_ptr.vmem [resolvable:$true] %s25_s25 }
   0x3   :  { %p558_p1 = scmp.lt.u32.totalorder %s554_s28, %s724_s3 }
   0x5   :  { %p560_p2 = pnand %p558_p1, %p555_p0 }
   0x7   :  { %563 = shalt.err (!%p560_p2)
}
   0x8   :  { %s564_s10 = scalar_lea.vmem %s26_s25, 2048  ;;  %p569_p4 = scmp.lt.s32.totalorder %s26_s25, %s26_s25 }
   0x9   :  { %p565_p3 = scmp.ne.s32.totalorder %s26_s25, %s564_s10  ;;  %p570_p5 = scmp.lt.s32.totalorder %s564_s10, %s564_s10 }
   0xb   :  { %p571_p6 = por %p570_p5, %p569_p4 }
   0xd   :  { %p572_p7 = pnand %p571_p6, %p565_p3 }
   0xf   :  { %575 = shalt.err (!%p572_p7)
}
  0x10   :  { %s603_s11 = smov 64   ;;  %s604_s12 = smov 4  }
  0x11   :  { %31 = dma.hbm_to_vmem [thread:$0]  %s724_s3, 2048, %s26_s25, [#allocation3], %s603_s11, %s603_s11, %s604_s12  }
  0x12   :  { %598 = dma.done.wait [#allocation3], 2048  }
  0x13   :  { %599 = vsyncadd [#allocation3], 4294965248  ;;  %v605_v0 = vmov 0   ;;  %v524_v1 = vld [vmem:[%s722_s1 + $0x4] ss:$8 sps:$4 sm:$0xff]   ;;  %vm80_vm0 = vcmask 261120   ;;  %v50_v30 = vlaneseq }
  0x14   :  { %116 = vmatprep.mubr.bf16.mxu0 %v605_v0  ;;  %v526_v2 = vld [vmem:[%s722_s1] ss:$8 sps:$4 sm:$0xff]   ;;  %84 = vmatprep.subr.bf16.mxu0 %v524_v1  ;;  %v527_v3 = vld [vmem:[%s722_s1 + $0x14] ss:$8 sps:$4 sm:$0xff]   ;;  %v529_v4 = vld [vmem:[%s722_s1 + $0x10] ss:$8 sps:$4 sm:$0xff]  }
  0x15   :  { %v42_v5 = vld [vmem:[%s721_s0] sm:$0xff]  ;;  %85 = vmatpush1.bf16.msra.mxu0 %v526_v2  ;;  %v532_v8 = vld [vmem:[#allocation2 + $0x48] sm:$0xff]   ;;  %v534_v11 = vld [vmem:[#allocation2 + $0x50] sm:$0xff]   ;;  %v606_v24 = vmov 0.0   ;;  %v51_v31 = vshrl.u32 %v50_v30, 7  ;;  %vm607_vm1 = vmmov 0  }
  0x16   :  { %v530_v6 = vld [vmem:[#allocation2 + $0x40] sm:$0xff]   ;;  %86 = vmatprep.subr.bf16.mxu0 %v527_v3  ;;  %v43_v9 = vpack.c.bf16 %v42_v5, %v42_v5  ;;  %v533_v10 = vld [vmem:[#allocation2 + $0x8] sm:$0xff]   ;;  %v535_v12 = vld [vmem:[#allocation2 + $0x10] sm:$0xff]   ;;  %vm418_vm2 = vcmask 130048  }
  0x17   :  { %v531_v7 = vld [vmem:[#allocation2] sm:$0xff]   ;;  %466 = vmatprep.subr.bf16.mxu1 %v530_v6  ;;  %v536_v13 = vld [vmem:[#allocation2 + $0x58] sm:$0xff]   ;;  %v540_v17 = vld [vmem:[#allocation2 + $0x68] sm:$0xff]   ;;  %v52_v32 = vsub.s32 0, %v51_v31  ;;  %v56_v34 = vsub.s32 1, %v51_v31 }
  0x18   :  { %467 = vmatpush3.bf16.msra.mxu1 %v531_v7  ;;  %v537_v14 = vld [vmem:[#allocation2 + $0x18] sm:$0xff]   ;;  %v538_v15 = vld [vmem:[#allocation2 + $0x60] sm:$0xff]   ;;  %v541_v18 = vld [vmem:[#allocation2 + $0x28] sm:$0xff]  }
  0x19   :  { %87 = vmatpush1.bf16.msra.mxu0 %v529_v4  ;;  %468 = vmatprep.subr.bf16.mxu1 %v532_v8  ;;  %v539_v16 = vld [vmem:[#allocation2 + $0x20] sm:$0xff]   ;;  %v542_v19 = vld [vmem:[#allocation2 + $0x70] sm:$0xff]   ;;  %v544_v21 = vld [vmem:[#allocation2 + $0x78] sm:$0xff]  }
  0x1a   :  { %v543_v20 = vld [vmem:[#allocation2 + $0x30] sm:$0xff]   ;;  %v545_v22 = vld [vmem:[#allocation2 + $0x38] sm:$0xff]   ;;  %v546_v23 = vld [vmem:[%s726_s5] sm:$0xff]   ;;  %497 = vmatprep.subr.bf16.mxu0 %v606_v24 }
  0x1b   :  { %v547_v25 = vld [vmem:[%s726_s5 + $0x8] sm:$0xff]   ;;  %v548_v26 = vld [vmem:[%s726_s5 + $0x10] sm:$0xff]   ;;  %v549_v27 = vld [vmem:[%s726_s5 + $0x18] sm:$0xff]  }
  0x1c   :  { %439 = vmatmul.mubr.msk.bf16.vlgmr.msra.gmra.mrb[0].mxu0 %vm80_vm0, %v43_v9  ;;  %469 = vmatpush3.bf16.msra.mxu1 %v533_v10  ;;  %v550_v28 = vld [vmem:[%s726_s5 + $0x20] sm:$0xff]   ;;  %v551_v29 = vld [vmem:[%s726_s5 + $0x28] sm:$0xff]   ;;  %v552_v47 = vld [vmem:[%s726_s5 + $0x30] sm:$0xff]  }
  0x1d   :  { %470 = vmatprep.subr.bf16.mxu1 %v534_v11  ;;  %498 = vmatpush3.bf16.msra.mxu0 %v546_v23  ;;  %v48_v33 = vld [vmem:[%s723_s2] sm:$0x3]  ;;  %v553_v48 = vld [vmem:[%s726_s5 + $0x38] sm:$0xff]   ;;  %s608_s5 = smov [#allocation5]  }
  0x1e   :  { %499 = vmatprep.subr.bf16.mxu0 %v606_v24  ;;  %v53_v35 = vrot.slane %v48_v33, %v52_v32  ;;  %v57_v36 = vrot.slane %v48_v33, %v56_v34  ;;  %513 = vmatprep.mubr.msk.bf16.mxu0 %vm607_vm1, %v606_v24  ;;  %v440_v50 = vld [vmem:[%s725_s4] ss:$0 sm:$0xff]  ;;  %s426_s20 = sshll.u32 %s608_s5, 4  ;;  %s427_s20 = int_to_ptr.vmem [resolvable:$true] %s426_s20 }
  0x1f   :  { %v457_v58 = vld [vmem:[%s727_s6] ss:$0 sm:$0xff]  ;;  %s576_s4 = scalar_lea.vmem %s427_s20, 128  ;;  %p581_p9 = scmp.lt.s32.totalorder %s427_s20, %s427_s20 }
  0x20   :  { %471 = vmatpush3.bf16.msra.mxu1 %v535_v12  ;;  %p577_p8 = scmp.ne.s32.totalorder %s427_s20, %s576_s4  ;;  %p582_p10 = scmp.lt.s32.totalorder %s576_s4, %s576_s4 }
  0x21   :  { %472 = vmatprep.subr.bf16.mxu1 %v536_v13  ;;  %500 = vmatpush3.bf16.msra.mxu0 %v547_v25 }
  0x22   :  { %501 = vmatprep.subr.bf16.mxu0 %v606_v24  ;;  %p583_p11 = por %p582_p10, %p581_p9 }
  0x24   :  { %473 = vmatpush3.bf16.msra.mxu1 %v537_v14  ;;  %p584_p12 = pnand %p583_p11, %p577_p8 }
  0x25   :  { %474 = vmatprep.subr.bf16.mxu1 %v538_v15  ;;  %502 = vmatpush3.bf16.msra.mxu0 %v548_v26 }
  0x26   :  { %503 = vmatprep.subr.bf16.mxu0 %v606_v24 }
  0x28   :  { %475 = vmatpush3.bf16.msra.mxu1 %v539_v16 }
  0x29   :  { %476 = vmatprep.subr.bf16.mxu1 %v540_v17  ;;  %504 = vmatpush3.bf16.msra.mxu0 %v549_v27 }
  0x2a   :  { %505 = vmatprep.subr.bf16.mxu0 %v606_v24 }
  0x2c   :  { %477 = vmatpush3.bf16.msra.mxu1 %v541_v18 }
  0x2d   :  { %478 = vmatprep.subr.bf16.mxu1 %v542_v19  ;;  %506 = vmatpush3.bf16.msra.mxu0 %v550_v28 }
  0x2e   :  { %507 = vmatprep.subr.bf16.mxu0 %v606_v24 }
  0x30   :  { %479 = vmatpush3.bf16.msra.mxu1 %v543_v20 }
  0x31   :  { %480 = vmatprep.subr.bf16.mxu1 %v544_v21  ;;  %508 = vmatpush3.bf16.msra.mxu0 %v551_v29 }
  0x32   :  { %509 = vmatprep.subr.bf16.mxu0 %v606_v24 }
  0x34   :  { %481 = vmatpush3.bf16.msra.mxu1 %v545_v22 }
  0x35   :  { %510 = vmatpush3.bf16.msra.mxu0 %v552_v47 }
  0x36   :  { %511 = vmatprep.subr.bf16.mxu0 %v606_v24 }
  0x39   :  { %512 = vmatpush3.bf16.msra.mxu0 %v553_v48 }
  0xef   :  { %v118_v37 = vpop.f32.mrb[0].mxu0 }
  0xf0   :  { %v119_v38 = vadd.f32 %v118_v37, %v53_v35  ;;  %v120_v39 = vpop.f32.mrb[1].mxu0 }
  0xf1   :  { %v121_v40 = vadd.f32 %v120_v39, %v57_v36  ;;  %v122_v41 = vpop.f32.mrb[2].mxu0 }
  0xf2   :  { %v125_v42 = vmax.f32 %v119_v38, 0.0  ;;  %v123_v43 = vpop.f32.mrb[3].mxu0 }
  0xf3   :  { %v126_v44 = vmax.f32 %v121_v40, 0.0 }
  0xf4   :  { %v127_v46 = vpack.c.bf16 %v125_v42, %v125_v42 }
  0xf5   :  { %v128_v45 = vpack.c.bf16 %v126_v44, %v126_v44 }
  0xf7   :  { %296 = vmatprep.mubr.bf16.mxu1 %v128_v45 }
  0xf8   :  { %297 = vmatmul.mubr.bf16.vlgmr.msra.gmra.mrb[0].mxu1 %v127_v46 }
 0x1cb   :  { %v482_v49 = vpop.f32.mrb[0].mxu1 }
 0x1cc   :  { %v483_v51 = vpop.f32.mrb[1].mxu1 }
 0x1cd   :  { %v484_v52 = vadd.f32 %v483_v51, %v482_v49  ;;  %v485_v53 = vpop.f32.mrb[2].mxu1 }
 0x1ce   :  { %v486_v54 = vpop.f32.mrb[3].mxu1 }
 0x1cf   :  { %v299_v55 = vadd.f32 %v484_v52, %v440_v50 }
 0x1d1   :  { %v304_v56 = vmax.f32 %v299_v55, 0.0 }
 0x1d3   :  { %v305_v57 = vpack.c.bf16 %v304_v56, %v304_v56 }
 0x1d5   :  { %514 = vmatmul.mubr.bf16.vlgmr.msra.gmra.mrb[4].mxu0 %v305_v57 }
 0x2a8   :  { %v411_v59 = vpop.f32.mrb[4].mxu0 }
 0x2a9   :  { %v412_v60 = vadd.f32 %v457_v58, %v411_v59  ;;  %v515_v61 = vpop.f32.mrb[5].mxu0 }
 0x2aa   :  { %v414_v62 = vpop.f32.mrb[6].mxu0 }
 0x2ab   :  { %v417_v63 = vmax.f32 %v412_v60, 0.0  ;;  %v516_v0 = vpop.f32.mrb[7].mxu0 }
 0x2ad   :  { %419 = vst.msk [vmem:[#allocation5] sm:$0xff] %vm418_vm2, %v417_v63 }
 0x2ae   :  { %587 = shalt.err (!%p584_p12)
}
 0x2af   :  { %s588_s22 = scalar_lea.hbm %s728_s7, 128 }
 0x2b0   :  { %p589_p13 = scmp.ne.s32.totalorder %s728_s7, %s588_s22  ;;  %p592_p0 = scmp.lt.u32.totalorder %s588_s22, %s728_s7 }
 0x2b2   :  { %p594_p1 = pnand %p592_p0, %p589_p13 }
 0x2b4   :  { %597 = shalt.err (!%p594_p1)
}
 0x2b5   :  { %429 = dma.vmem_to_hbm [thread:$0]  %s427_s20, 128, %s728_s7, [#allocation4]  }
 0x2b6   :  { %600 = dma.done.wait [#allocation4], 128  }
 0x2b7   :  { %601 = vsyncadd [#allocation4], 4294967168 }
 0x2b8   :  { %433 = vsyncpa [#allocation3], 1 }
 0x2b9   :  { %434 = vsyncpa [#allocation4], 1 }

</bundles_post_ra>
